<compile_context>
chip_gen: v5e
topology: v5e:2x2
jax: 0.10.0
libtpu: 0.0.40
codegen_flags: <defaults>
</compile_context>

<pallas_src>
import functools

import jax
import jax.numpy as jnp
from jax import lax
from jax.experimental import pallas as pl
from jax.experimental.pallas import tpu as pltpu


def _resblock_kernel(x_ref, masks_ref, w1_ref, b1_ref, w2_ref, b2_ref, o_ref,
                     act_ref, col_ref, *, B_TILE, C, HW, tap_offsets,
                     res_scale):
    """One block of B_TILE images per grid step.

    x_ref     : (B_TILE, C, HW)        unpadded input block (f32, HW lanes)
    masks_ref : (K*K, B_TILE*HW)       per-tap validity masks (0/1 f32), resident
    w1_ref    : (C, K*K*C)             conv1 weights, [co, t*C + ci], resident
    b1_ref    : (C, 1)                 conv1 bias
    w2_ref    : (C, K*K*C)             conv2 weights, resident
    b2_ref    : (C, 1)                 conv2 bias
    o_ref     : (B_TILE, C, HW)        output block (f32)
    act_ref   : (C, B_TILE*HW)  VMEM   current activation, batch merged into lanes
    col_ref   : (K*K*C, B_TILE*HW) VMEM  shifted+masked "im2col" rows
    """
    BHW = B_TILE * HW

    # ---- channel-major gather of the input block (lane-aligned row copies) --
    for b in range(B_TILE):
        act_ref[:, b * HW:(b + 1) * HW] = x_ref[b]

    masks = masks_ref[...]                                   # (K*K, BHW)

    def conv(w_ref):
        # "same"-padded KxK conv: K*K lane rotations (XLU) + masks (VPU) build
        # the column matrix, then ONE MXU matmul whose output lane dim is BHW.
        a = act_ref[...]                                      # (C, BHW)
        for t, off in enumerate(tap_offsets):
            shifted = pltpu.roll(a, shift=(-off) % BHW, axis=1)
            col_ref[t * C:(t + 1) * C, :] = shifted * masks[t][None, :]
        return jnp.dot(w_ref[...], col_ref[...],
                       preferred_element_type=jnp.float32)    # (C, BHW)

    # ---- conv1 + bias + ReLU ------------------------------------------------
    y1 = jnp.maximum(conv(w1_ref) + b1_ref[...], 0.0)
    act_ref[...] = y1

    # ---- conv2 + bias ---------------------------------------------------------
    y2 = conv(w2_ref) + b2_ref[...]

    # ---- residual: out = res_scale * body(x) + x  (all f32, exact skip) ------
    for b in range(B_TILE):
        o_ref[b] = y2[:, b * HW:(b + 1) * HW] * res_scale + x_ref[b]


def resblock_pallas(x_nchw, w1, b1, w2, b2, *, res_scale=1.0, b_tile=2):
    """x_nchw: (N, C, H, W) f32; w*: (K, K, Cin, Cout) HWIO; b*: (C,)."""
    N, C, H, W = x_nchw.shape
    K = w1.shape[0]
    p = K // 2
    HW = H * W
    kk = K * K
    assert N % b_tile == 0, "batch must be divisible by b_tile"
    # HW is a multiple of 128 here (16*16=256) -> fully lane-dense blocks; for
    # general shapes pad HW up to a 128 multiple to keep stores unmasked.

    # NCHW -> (N, C, H*W): metadata-only reshape (no transpose, no padded copy).
    x_flat = x_nchw.reshape(N, C, HW).astype(jnp.float32)

    # Per-tap lane offsets + validity masks ("same" zero-padding by masking).
    hh = jnp.arange(HW, dtype=jnp.int32) // W
    ww = jnp.arange(HW, dtype=jnp.int32) % W
    offsets, mask_rows = [], []
    for kh in range(K):
        for kw in range(K):
            dh, dw = kh - p, kw - p
            offsets.append(dh * W + dw)
            valid = ((hh + dh >= 0) & (hh + dh < H) &
                     (ww + dw >= 0) & (ww + dw < W))
            mask_rows.append(valid.astype(jnp.float32))
    masks = jnp.tile(jnp.stack(mask_rows), (1, b_tile))       # (K*K, b_tile*HW)

    # Weights (K,K,Cin,Cout) -> (Cout, K*K*Cin), matching the col row order.
    w1_t = w1.reshape(kk * C, C).T.astype(jnp.float32)
    w2_t = w2.reshape(kk * C, C).T.astype(jnp.float32)
    b1_c = b1.reshape(C, 1).astype(jnp.float32)
    b2_c = b2.reshape(C, 1).astype(jnp.float32)

    # VMEM budget derived from shapes (review: don't hardcode; stay well under
    # v7x's 64 MiB physical VMEM while allowing double buffering).
    f32b = 4
    io_block = b_tile * C * HW * f32b
    resident = (kk * b_tile * HW + 2 * C * kk * C + 2 * C) * f32b
    scratch = (kk * C + C) * b_tile * HW * f32b
    est = 2 * (io_block + io_block) + 2 * resident + scratch
    vmem_limit = int(min(max(4 * est, 16 << 20), 48 << 20))

    kernel = functools.partial(
        _resblock_kernel, B_TILE=b_tile, C=C, HW=HW,
        tap_offsets=tuple(offsets), res_scale=float(res_scale))

    out = pl.pallas_call(
        kernel,
        out_shape=jax.ShapeDtypeStruct((N, C, HW), jnp.float32),
        grid_spec=pltpu.PrefetchScalarGridSpec(
            num_scalar_prefetch=0,
            grid=(N // b_tile,),
            in_specs=[
                # input block: b_tile images per step, lane-dense last dim HW
                pl.BlockSpec((b_tile, C, HW), lambda i: (i, 0, 0)),
                # masks / weights / biases: constant index_map -> fetched once,
                # VMEM-resident.  (pl.Buffered(1) single-buffering is a further
                # VMEM saving worth enabling at real n_feats sizes.)
                pl.BlockSpec((kk, b_tile * HW), lambda i: (0, 0)),
                pl.BlockSpec((C, kk * C), lambda i: (0, 0)),
                pl.BlockSpec((C, 1), lambda i: (0, 0)),
                pl.BlockSpec((C, kk * C), lambda i: (0, 0)),
                pl.BlockSpec((C, 1), lambda i: (0, 0)),
            ],
            out_specs=pl.BlockSpec((b_tile, C, HW), lambda i: (i, 0, 0)),
            scratch_shapes=[
                pltpu.VMEM((C, b_tile * HW), jnp.float32),        # activation
                pltpu.VMEM((kk * C, b_tile * HW), jnp.float32),   # col matrix
            ],
        ),
        compiler_params=pltpu.CompilerParams(
            dimension_semantics=("parallel",),
            vmem_limit_bytes=vmem_limit,
        ),
    )(x_flat, masks, w1_t, b1_c, w2_t, b2_c)

    return out.reshape(N, C, H, W)          # metadata-only reshape back to NCHW


def _reference(x, w1, b1, w2, b2, res_scale=1.0):
    """Pure-JAX reference (NCHW convs, high-precision MXU passes)."""
    dn = lax.conv_dimension_numbers(x.shape, w1.shape, ("NCHW", "HWIO", "NCHW"))
    y = lax.conv_general_dilated(x, w1, (1, 1), "SAME", dimension_numbers=dn,
                                 precision=lax.Precision.HIGHEST)
    y = jnp.maximum(y + b1[None, :, None, None], 0.0)
    y = lax.conv_general_dilated(y, w2, (1, 1), "SAME", dimension_numbers=dn,
                                 precision=lax.Precision.HIGHEST)
    y = y + b2[None, :, None, None]
    return y * res_scale + x


if __name__ == "__main__":
    # ResBlock(conv, n_feats=8, kernel_size=3), batch 8 so the parallel grid
    # has 4 steps (>=2 per TensorCore on v7x, pipelined on v5e/v6e).
    N, C, H, W = 8, 8, 16, 16
    K = 3
    res_scale = 1.0

    key = jax.random.PRNGKey(0)
    kx, kw1, kb1, kw2, kb2 = jax.random.split(key, 5)
    x = jax.random.normal(kx, (N, C, H, W), dtype=jnp.float32)
    w1 = jax.random.normal(kw1, (K, K, C, C), dtype=jnp.float32) * 0.1
    b1 = jax.random.normal(kb1, (C,), dtype=jnp.float32) * 0.1
    w2 = jax.random.normal(kw2, (K, K, C, C), dtype=jnp.float32) * 0.1
    b2 = jax.random.normal(kb2, (C,), dtype=jnp.float32) * 0.1

    out = jax.block_until_ready(
        resblock_pallas(x, w1, b1, w2, b2, res_scale=res_scale, b_tile=2))
    ref = _reference(x, w1, b1, w2, b2, res_scale=res_scale)

    assert out.shape == (N, C, H, W)
    # f32 end-to-end; only MXU multiply rounding differs from the XLA conv.
    err = float(jnp.max(jnp.abs(out - ref)))
    assert jnp.allclose(out, ref, atol=2e-2, rtol=2e-2), (
        f"mismatch vs reference (max abs err {err})")
    print("KERNEL_OK")
</pallas_src>

<mosaic_0001>
module attributes {stable_mosaic.version = 11 : i64} {
  func.func @_resblock_kernel(%arg0: i32, %arg1: memref<2x8x256xf32, #tpu.memory_space<vmem>>, %arg2: memref<9x512xf32, #tpu.memory_space<vmem>>, %arg3: memref<8x72xf32, #tpu.memory_space<vmem>>, %arg4: memref<8x1xf32, #tpu.memory_space<vmem>>, %arg5: memref<8x72xf32, #tpu.memory_space<vmem>>, %arg6: memref<8x1xf32, #tpu.memory_space<vmem>>, %arg7: memref<2x8x256xf32, #tpu.memory_space<vmem>>, %arg8: memref<8x512xf32, #tpu.memory_space<vmem>>, %arg9: memref<72x512xf32, #tpu.memory_space<vmem>>) attributes {dimension_semantics = [#tpu.dimension_semantics<parallel>], iteration_bounds = array<i64: 4>, scalar_prefetch = 0 : i64, scratch_operands = 2 : i64, tpu.core_type = #tpu.core_type<tc>, window_params = [{transform_indices = @transform_0, window_bounds = array<i64: 2, 8, 256>}, {pipeline_mode = #tpu.pipeline_mode<synchronous>, transform_indices = @transform_1, window_bounds = array<i64: 9, 512>}, {pipeline_mode = #tpu.pipeline_mode<synchronous>, transform_indices = @transform_2, window_bounds = array<i64: 8, 72>}, {pipeline_mode = #tpu.pipeline_mode<synchronous>, transform_indices = @transform_3, window_bounds = array<i64: 8, 1>}, {pipeline_mode = #tpu.pipeline_mode<synchronous>, transform_indices = @transform_4, window_bounds = array<i64: 8, 72>}, {pipeline_mode = #tpu.pipeline_mode<synchronous>, transform_indices = @transform_5, window_bounds = array<i64: 8, 1>}, {transform_indices = @transform_6, window_bounds = array<i64: 2, 8, 256>}]} {
    %c0 = arith.constant 0 : index
    %c0_0 = arith.constant 0 : index
    %c0_1 = arith.constant 0 : index
    %0 = vector.load %arg1[%c0, %c0_0, %c0_1] : memref<2x8x256xf32, #tpu.memory_space<vmem>>, vector<1x8x256xf32>
    %1 = vector.shape_cast %0 : vector<1x8x256xf32> to vector<8x256xf32>
    %c0_2 = arith.constant 0 : index
    %c0_3 = arith.constant 0 : index
    %2 = vector.load %arg8[%c0_2, %c0_3] : memref<8x512xf32, #tpu.memory_space<vmem>>, vector<8x256xf32>
    tpu.vector_store %arg8[%c0_2, %c0_3], %1 {strides = array<i32>} : memref<8x512xf32, #tpu.memory_space<vmem>>, vector<8x256xf32>,
    %c1 = arith.constant 1 : index
    %c0_4 = arith.constant 0 : index
    %c0_5 = arith.constant 0 : index
    %3 = vector.load %arg1[%c1, %c0_4, %c0_5] : memref<2x8x256xf32, #tpu.memory_space<vmem>>, vector<1x8x256xf32>
    %4 = vector.shape_cast %3 : vector<1x8x256xf32> to vector<8x256xf32>
    %c0_6 = arith.constant 0 : index
    %c256 = arith.constant 256 : index
    %5 = vector.load %arg8[%c0_6, %c256] : memref<8x512xf32, #tpu.memory_space<vmem>>, vector<8x256xf32>
    tpu.vector_store %arg8[%c0_6, %c256], %4 {strides = array<i32>} : memref<8x512xf32, #tpu.memory_space<vmem>>, vector<8x256xf32>,
    %c0_7 = arith.constant 0 : index
    %c0_8 = arith.constant 0 : index
    %6 = vector.load %arg2[%c0_7, %c0_8] : memref<9x512xf32, #tpu.memory_space<vmem>>, vector<9x512xf32>
    %c0_9 = arith.constant 0 : index
    %c0_10 = arith.constant 0 : index
    %7 = vector.load %arg8[%c0_9, %c0_10] : memref<8x512xf32, #tpu.memory_space<vmem>>, vector<8x512xf32>
    %c17_i32 = arith.constant 17 : i32
    %8 = tpu.dynamic_rotate %7 by %c17_i32 dim 1 : vector<8x512xf32>, i32 -> vector<8x512xf32>
    %9 = vector.extract_strided_slice %6 {offsets = [0, 0], sizes = [1, 512], strides = [1, 1]} : vector<9x512xf32> to vector<1x512xf32>
    %10 = vector.shape_cast %9 : vector<1x512xf32> to vector<512xf32>
    %11 = vector.shape_cast %10 : vector<512xf32> to vector<1x512xf32>
    %12 = vector.broadcast %11 : vector<1x512xf32> to vector<8x512xf32>
    %13 = arith.mulf %8, %12 : vector<8x512xf32>
    %c0_11 = arith.constant 0 : index
    %c0_12 = arith.constant 0 : index
    %14 = vector.load %arg9[%c0_11, %c0_12] : memref<72x512xf32, #tpu.memory_space<vmem>>, vector<8x512xf32>
    tpu.vector_store %arg9[%c0_11, %c0_12], %13 {strides = array<i32>} : memref<72x512xf32, #tpu.memory_space<vmem>>, vector<8x512xf32>,
    %c16_i32 = arith.constant 16 : i32
    %15 = tpu.dynamic_rotate %7 by %c16_i32 dim 1 : vector<8x512xf32>, i32 -> vector<8x512xf32>
    %16 = vector.extract_strided_slice %6 {offsets = [1, 0], sizes = [1, 512], strides = [1, 1]} : vector<9x512xf32> to vector<1x512xf32>
    %17 = vector.shape_cast %16 : vector<1x512xf32> to vector<512xf32>
    %18 = vector.shape_cast %17 : vector<512xf32> to vector<1x512xf32>
    %19 = vector.broadcast %18 : vector<1x512xf32> to vector<8x512xf32>
    %20 = arith.mulf %15, %19 : vector<8x512xf32>
    %c8 = arith.constant 8 : index
    %c0_13 = arith.constant 0 : index
    %21 = vector.load %arg9[%c8, %c0_13] : memref<72x512xf32, #tpu.memory_space<vmem>>, vector<8x512xf32>
    tpu.vector_store %arg9[%c8, %c0_13], %20 {strides = array<i32>} : memref<72x512xf32, #tpu.memory_space<vmem>>, vector<8x512xf32>,
    %c15_i32 = arith.constant 15 : i32
    %22 = tpu.dynamic_rotate %7 by %c15_i32 dim 1 : vector<8x512xf32>, i32 -> vector<8x512xf32>
    %23 = vector.extract_strided_slice %6 {offsets = [2, 0], sizes = [1, 512], strides = [1, 1]} : vector<9x512xf32> to vector<1x512xf32>
    %24 = vector.shape_cast %23 : vector<1x512xf32> to vector<512xf32>
    %25 = vector.shape_cast %24 : vector<512xf32> to vector<1x512xf32>
    %26 = vector.broadcast %25 : vector<1x512xf32> to vector<8x512xf32>
    %27 = arith.mulf %22, %26 : vector<8x512xf32>
    %c16 = arith.constant 16 : index
    %c0_14 = arith.constant 0 : index
    %28 = vector.load %arg9[%c16, %c0_14] : memref<72x512xf32, #tpu.memory_space<vmem>>, vector<8x512xf32>
    tpu.vector_store %arg9[%c16, %c0_14], %27 {strides = array<i32>} : memref<72x512xf32, #tpu.memory_space<vmem>>, vector<8x512xf32>,
    %c1_i32 = arith.constant 1 : i32
    %29 = tpu.dynamic_rotate %7 by %c1_i32 dim 1 : vector<8x512xf32>, i32 -> vector<8x512xf32>
    %30 = vector.extract_strided_slice %6 {offsets = [3, 0], sizes = [1, 512], strides = [1, 1]} : vector<9x512xf32> to vector<1x512xf32>
    %31 = vector.shape_cast %30 : vector<1x512xf32> to vector<512xf32>
    %32 = vector.shape_cast %31 : vector<512xf32> to vector<1x512xf32>
    %33 = vector.broadcast %32 : vector<1x512xf32> to vector<8x512xf32>
    %34 = arith.mulf %29, %33 : vector<8x512xf32>
    %c24 = arith.constant 24 : index
    %c0_15 = arith.constant 0 : index
    %35 = vector.load %arg9[%c24, %c0_15] : memref<72x512xf32, #tpu.memory_space<vmem>>, vector<8x512xf32>
    tpu.vector_store %arg9[%c24, %c0_15], %34 {strides = array<i32>} : memref<72x512xf32, #tpu.memory_space<vmem>>, vector<8x512xf32>,
    %c0_i32 = arith.constant 0 : i32
    %36 = tpu.dynamic_rotate %7 by %c0_i32 dim 1 : vector<8x512xf32>, i32 -> vector<8x512xf32>
    %37 = vector.extract_strided_slice %6 {offsets = [4, 0], sizes = [1, 512], strides = [1, 1]} : vector<9x512xf32> to vector<1x512xf32>
    %38 = vector.shape_cast %37 : vector<1x512xf32> to vector<512xf32>
    %39 = vector.shape_cast %38 : vector<512xf32> to vector<1x512xf32>
    %40 = vector.broadcast %39 : vector<1x512xf32> to vector<8x512xf32>
    %41 = arith.mulf %36, %40 : vector<8x512xf32>
    %c32 = arith.constant 32 : index
    %c0_16 = arith.constant 0 : index
    %42 = vector.load %arg9[%c32, %c0_16] : memref<72x512xf32, #tpu.memory_space<vmem>>, vector<8x512xf32>
    tpu.vector_store %arg9[%c32, %c0_16], %41 {strides = array<i32>} : memref<72x512xf32, #tpu.memory_space<vmem>>, vector<8x512xf32>,
    %c511_i32 = arith.constant 511 : i32
    %43 = tpu.dynamic_rotate %7 by %c511_i32 dim 1 : vector<8x512xf32>, i32 -> vector<8x512xf32>
    %44 = vector.extract_strided_slice %6 {offsets = [5, 0], sizes = [1, 512], strides = [1, 1]} : vector<9x512xf32> to vector<1x512xf32>
    %45 = vector.shape_cast %44 : vector<1x512xf32> to vector<512xf32>
    %46 = vector.shape_cast %45 : vector<512xf32> to vector<1x512xf32>
    %47 = vector.broadcast %46 : vector<1x512xf32> to vector<8x512xf32>
    %48 = arith.mulf %43, %47 : vector<8x512xf32>
    %c40 = arith.constant 40 : index
    %c0_17 = arith.constant 0 : index
    %49 = vector.load %arg9[%c40, %c0_17] : memref<72x512xf32, #tpu.memory_space<vmem>>, vector<8x512xf32>
    tpu.vector_store %arg9[%c40, %c0_17], %48 {strides = array<i32>} : memref<72x512xf32, #tpu.memory_space<vmem>>, vector<8x512xf32>,
    %c497_i32 = arith.constant 497 : i32
    %50 = tpu.dynamic_rotate %7 by %c497_i32 dim 1 : vector<8x512xf32>, i32 -> vector<8x512xf32>
    %51 = vector.extract_strided_slice %6 {offsets = [6, 0], sizes = [1, 512], strides = [1, 1]} : vector<9x512xf32> to vector<1x512xf32>
    %52 = vector.shape_cast %51 : vector<1x512xf32> to vector<512xf32>
    %53 = vector.shape_cast %52 : vector<512xf32> to vector<1x512xf32>
    %54 = vector.broadcast %53 : vector<1x512xf32> to vector<8x512xf32>
    %55 = arith.mulf %50, %54 : vector<8x512xf32>
    %c48 = arith.constant 48 : index
    %c0_18 = arith.constant 0 : index
    %56 = vector.load %arg9[%c48, %c0_18] : memref<72x512xf32, #tpu.memory_space<vmem>>, vector<8x512xf32>
    tpu.vector_store %arg9[%c48, %c0_18], %55 {strides = array<i32>} : memref<72x512xf32, #tpu.memory_space<vmem>>, vector<8x512xf32>,
    %c496_i32 = arith.constant 496 : i32
    %57 = tpu.dynamic_rotate %7 by %c496_i32 dim 1 : vector<8x512xf32>, i32 -> vector<8x512xf32>
    %58 = vector.extract_strided_slice %6 {offsets = [7, 0], sizes = [1, 512], strides = [1, 1]} : vector<9x512xf32> to vector<1x512xf32>
    %59 = vector.shape_cast %58 : vector<1x512xf32> to vector<512xf32>
    %60 = vector.shape_cast %59 : vector<512xf32> to vector<1x512xf32>
    %61 = vector.broadcast %60 : vector<1x512xf32> to vector<8x512xf32>
    %62 = arith.mulf %57, %61 : vector<8x512xf32>
    %c56 = arith.constant 56 : index
    %c0_19 = arith.constant 0 : index
    %63 = vector.load %arg9[%c56, %c0_19] : memref<72x512xf32, #tpu.memory_space<vmem>>, vector<8x512xf32>
    tpu.vector_store %arg9[%c56, %c0_19], %62 {strides = array<i32>} : memref<72x512xf32, #tpu.memory_space<vmem>>, vector<8x512xf32>,
    %c495_i32 = arith.constant 495 : i32
    %64 = tpu.dynamic_rotate %7 by %c495_i32 dim 1 : vector<8x512xf32>, i32 -> vector<8x512xf32>
    %65 = vector.extract_strided_slice %6 {offsets = [8, 0], sizes = [1, 512], strides = [1, 1]} : vector<9x512xf32> to vector<1x512xf32>
    %66 = vector.shape_cast %65 : vector<1x512xf32> to vector<512xf32>
    %67 = vector.shape_cast %66 : vector<512xf32> to vector<1x512xf32>
    %68 = vector.broadcast %67 : vector<1x512xf32> to vector<8x512xf32>
    %69 = arith.mulf %64, %68 : vector<8x512xf32>
    %c64 = arith.constant 64 : index
    %c0_20 = arith.constant 0 : index
    %70 = vector.load %arg9[%c64, %c0_20] : memref<72x512xf32, #tpu.memory_space<vmem>>, vector<8x512xf32>
    tpu.vector_store %arg9[%c64, %c0_20], %69 {strides = array<i32>} : memref<72x512xf32, #tpu.memory_space<vmem>>, vector<8x512xf32>,
    %c0_21 = arith.constant 0 : index
    %c0_22 = arith.constant 0 : index
    %71 = vector.load %arg3[%c0_21, %c0_22] : memref<8x72xf32, #tpu.memory_space<vmem>>, vector<8x72xf32>
    %c0_23 = arith.constant 0 : index
    %c0_24 = arith.constant 0 : index
    %72 = vector.load %arg9[%c0_23, %c0_24] : memref<72x512xf32, #tpu.memory_space<vmem>>, vector<72x512xf32>
    %cst = arith.constant dense<0.000000e+00> : vector<8x512xf32>
    %73 = tpu.matmul %71, %72, %cst {dimension_numbers = #tpu.dot_dimension_numbers<[1], [0], [0], [1], [0, 0, 1, 1], [], []>} : vector<8x72xf32>, vector<72x512xf32>, vector<8x512xf32> -> vector<8x512xf32>
    %c0_25 = arith.constant 0 : index
    %c0_26 = arith.constant 0 : index
    %74 = vector.load %arg4[%c0_25, %c0_26] : memref<8x1xf32, #tpu.memory_space<vmem>>, vector<8x1xf32>
    %75 = vector.broadcast %74 : vector<8x1xf32> to vector<8x512xf32>
    %76 = arith.addf %73, %75 : vector<8x512xf32>
    %cst_27 = arith.constant 0.000000e+00 : f32
    %77 = vector.broadcast %cst_27 : f32 to vector<8x512xf32>
    %78 = arith.maximumf %76, %77 : vector<8x512xf32>
    %c0_28 = arith.constant 0 : index
    %c0_29 = arith.constant 0 : index
    %79 = vector.load %arg8[%c0_28, %c0_29] : memref<8x512xf32, #tpu.memory_space<vmem>>, vector<8x512xf32>
    tpu.vector_store %arg8[%c0_28, %c0_29], %78 {strides = array<i32>} : memref<8x512xf32, #tpu.memory_space<vmem>>, vector<8x512xf32>,
    %c0_30 = arith.constant 0 : index
    %c0_31 = arith.constant 0 : index
    %80 = vector.load %arg8[%c0_30, %c0_31] : memref<8x512xf32, #tpu.memory_space<vmem>>, vector<8x512xf32>
    %c17_i32_32 = arith.constant 17 : i32
    %81 = tpu.dynamic_rotate %80 by %c17_i32_32 dim 1 : vector<8x512xf32>, i32 -> vector<8x512xf32>
    %82 = vector.extract_strided_slice %6 {offsets = [0, 0], sizes = [1, 512], strides = [1, 1]} : vector<9x512xf32> to vector<1x512xf32>
    %83 = vector.shape_cast %82 : vector<1x512xf32> to vector<512xf32>
    %84 = vector.shape_cast %83 : vector<512xf32> to vector<1x512xf32>
    %85 = vector.broadcast %84 : vector<1x512xf32> to vector<8x512xf32>
    %86 = arith.mulf %81, %85 : vector<8x512xf32>
    %c0_33 = arith.constant 0 : index
    %c0_34 = arith.constant 0 : index
    %87 = vector.load %arg9[%c0_33, %c0_34] : memref<72x512xf32, #tpu.memory_space<vmem>>, vector<8x512xf32>
    tpu.vector_store %arg9[%c0_33, %c0_34], %86 {strides = array<i32>} : memref<72x512xf32, #tpu.memory_space<vmem>>, vector<8x512xf32>,
    %c16_i32_35 = arith.constant 16 : i32
    %88 = tpu.dynamic_rotate %80 by %c16_i32_35 dim 1 : vector<8x512xf32>, i32 -> vector<8x512xf32>
    %89 = vector.extract_strided_slice %6 {offsets = [1, 0], sizes = [1, 512], strides = [1, 1]} : vector<9x512xf32> to vector<1x512xf32>
    %90 = vector.shape_cast %89 : vector<1x512xf32> to vector<512xf32>
    %91 = vector.shape_cast %90 : vector<512xf32> to vector<1x512xf32>
    %92 = vector.broadcast %91 : vector<1x512xf32> to vector<8x512xf32>
    %93 = arith.mulf %88, %92 : vector<8x512xf32>
    %c8_36 = arith.constant 8 : index
    %c0_37 = arith.constant 0 : index
    %94 = vector.load %arg9[%c8_36, %c0_37] : memref<72x512xf32, #tpu.memory_space<vmem>>, vector<8x512xf32>
    tpu.vector_store %arg9[%c8_36, %c0_37], %93 {strides = array<i32>} : memref<72x512xf32, #tpu.memory_space<vmem>>, vector<8x512xf32>,
    %c15_i32_38 = arith.constant 15 : i32
    %95 = tpu.dynamic_rotate %80 by %c15_i32_38 dim 1 : vector<8x512xf32>, i32 -> vector<8x512xf32>
    %96 = vector.extract_strided_slice %6 {offsets = [2, 0], sizes = [1, 512], strides = [1, 1]} : vector<9x512xf32> to vector<1x512xf32>
    %97 = vector.shape_cast %96 : vector<1x512xf32> to vector<512xf32>
    %98 = vector.shape_cast %97 : vector<512xf32> to vector<1x512xf32>
    %99 = vector.broadcast %98 : vector<1x512xf32> to vector<8x512xf32>
    %100 = arith.mulf %95, %99 : vector<8x512xf32>
    %c16_39 = arith.constant 16 : index
    %c0_40 = arith.constant 0 : index
    %101 = vector.load %arg9[%c16_39, %c0_40] : memref<72x512xf32, #tpu.memory_space<vmem>>, vector<8x512xf32>
    tpu.vector_store %arg9[%c16_39, %c0_40], %100 {strides = array<i32>} : memref<72x512xf32, #tpu.memory_space<vmem>>, vector<8x512xf32>,
    %c1_i32_41 = arith.constant 1 : i32
    %102 = tpu.dynamic_rotate %80 by %c1_i32_41 dim 1 : vector<8x512xf32>, i32 -> vector<8x512xf32>
    %103 = vector.extract_strided_slice %6 {offsets = [3, 0], sizes = [1, 512], strides = [1, 1]} : vector<9x512xf32> to vector<1x512xf32>
    %104 = vector.shape_cast %103 : vector<1x512xf32> to vector<512xf32>
    %105 = vector.shape_cast %104 : vector<512xf32> to vector<1x512xf32>
    %106 = vector.broadcast %105 : vector<1x512xf32> to vector<8x512xf32>
    %107 = arith.mulf %102, %106 : vector<8x512xf32>
    %c24_42 = arith.constant 24 : index
    %c0_43 = arith.constant 0 : index
    %108 = vector.load %arg9[%c24_42, %c0_43] : memref<72x512xf32, #tpu.memory_space<vmem>>, vector<8x512xf32>
    tpu.vector_store %arg9[%c24_42, %c0_43], %107 {strides = array<i32>} : memref<72x512xf32, #tpu.memory_space<vmem>>, vector<8x512xf32>,
    %c0_i32_44 = arith.constant 0 : i32
    %109 = tpu.dynamic_rotate %80 by %c0_i32_44 dim 1 : vector<8x512xf32>, i32 -> vector<8x512xf32>
    %110 = vector.extract_strided_slice %6 {offsets = [4, 0], sizes = [1, 512], strides = [1, 1]} : vector<9x512xf32> to vector<1x512xf32>
    %111 = vector.shape_cast %110 : vector<1x512xf32> to vector<512xf32>
    %112 = vector.shape_cast %111 : vector<512xf32> to vector<1x512xf32>
    %113 = vector.broadcast %112 : vector<1x512xf32> to vector<8x512xf32>
    %114 = arith.mulf %109, %113 : vector<8x512xf32>
    %c32_45 = arith.constant 32 : index
    %c0_46 = arith.constant 0 : index
    %115 = vector.load %arg9[%c32_45, %c0_46] : memref<72x512xf32, #tpu.memory_space<vmem>>, vector<8x512xf32>
    tpu.vector_store %arg9[%c32_45, %c0_46], %114 {strides = array<i32>} : memref<72x512xf32, #tpu.memory_space<vmem>>, vector<8x512xf32>,
    %c511_i32_47 = arith.constant 511 : i32
    %116 = tpu.dynamic_rotate %80 by %c511_i32_47 dim 1 : vector<8x512xf32>, i32 -> vector<8x512xf32>
    %117 = vector.extract_strided_slice %6 {offsets = [5, 0], sizes = [1, 512], strides = [1, 1]} : vector<9x512xf32> to vector<1x512xf32>
    %118 = vector.shape_cast %117 : vector<1x512xf32> to vector<512xf32>
    %119 = vector.shape_cast %118 : vector<512xf32> to vector<1x512xf32>
    %120 = vector.broadcast %119 : vector<1x512xf32> to vector<8x512xf32>
    %121 = arith.mulf %116, %120 : vector<8x512xf32>
    %c40_48 = arith.constant 40 : index
    %c0_49 = arith.constant 0 : index
    %122 = vector.load %arg9[%c40_48, %c0_49] : memref<72x512xf32, #tpu.memory_space<vmem>>, vector<8x512xf32>
    tpu.vector_store %arg9[%c40_48, %c0_49], %121 {strides = array<i32>} : memref<72x512xf32, #tpu.memory_space<vmem>>, vector<8x512xf32>,
    %c497_i32_50 = arith.constant 497 : i32
    %123 = tpu.dynamic_rotate %80 by %c497_i32_50 dim 1 : vector<8x512xf32>, i32 -> vector<8x512xf32>
    %124 = vector.extract_strided_slice %6 {offsets = [6, 0], sizes = [1, 512], strides = [1, 1]} : vector<9x512xf32> to vector<1x512xf32>
    %125 = vector.shape_cast %124 : vector<1x512xf32> to vector<512xf32>
    %126 = vector.shape_cast %125 : vector<512xf32> to vector<1x512xf32>
    %127 = vector.broadcast %126 : vector<1x512xf32> to vector<8x512xf32>
    %128 = arith.mulf %123, %127 : vector<8x512xf32>
    %c48_51 = arith.constant 48 : index
    %c0_52 = arith.constant 0 : index
    %129 = vector.load %arg9[%c48_51, %c0_52] : memref<72x512xf32, #tpu.memory_space<vmem>>, vector<8x512xf32>
    tpu.vector_store %arg9[%c48_51, %c0_52], %128 {strides = array<i32>} : memref<72x512xf32, #tpu.memory_space<vmem>>, vector<8x512xf32>,
    %c496_i32_53 = arith.constant 496 : i32
    %130 = tpu.dynamic_rotate %80 by %c496_i32_53 dim 1 : vector<8x512xf32>, i32 -> vector<8x512xf32>
    %131 = vector.extract_strided_slice %6 {offsets = [7, 0], sizes = [1, 512], strides = [1, 1]} : vector<9x512xf32> to vector<1x512xf32>
    %132 = vector.shape_cast %131 : vector<1x512xf32> to vector<512xf32>
    %133 = vector.shape_cast %132 : vector<512xf32> to vector<1x512xf32>
    %134 = vector.broadcast %133 : vector<1x512xf32> to vector<8x512xf32>
    %135 = arith.mulf %130, %134 : vector<8x512xf32>
    %c56_54 = arith.constant 56 : index
    %c0_55 = arith.constant 0 : index
    %136 = vector.load %arg9[%c56_54, %c0_55] : memref<72x512xf32, #tpu.memory_space<vmem>>, vector<8x512xf32>
    tpu.vector_store %arg9[%c56_54, %c0_55], %135 {strides = array<i32>} : memref<72x512xf32, #tpu.memory_space<vmem>>, vector<8x512xf32>,
    %c495_i32_56 = arith.constant 495 : i32
    %137 = tpu.dynamic_rotate %80 by %c495_i32_56 dim 1 : vector<8x512xf32>, i32 -> vector<8x512xf32>
    %138 = vector.extract_strided_slice %6 {offsets = [8, 0], sizes = [1, 512], strides = [1, 1]} : vector<9x512xf32> to vector<1x512xf32>
    %139 = vector.shape_cast %138 : vector<1x512xf32> to vector<512xf32>
    %140 = vector.shape_cast %139 : vector<512xf32> to vector<1x512xf32>
    %141 = vector.broadcast %140 : vector<1x512xf32> to vector<8x512xf32>
    %142 = arith.mulf %137, %141 : vector<8x512xf32>
    %c64_57 = arith.constant 64 : index
    %c0_58 = arith.constant 0 : index
    %143 = vector.load %arg9[%c64_57, %c0_58] : memref<72x512xf32, #tpu.memory_space<vmem>>, vector<8x512xf32>
    tpu.vector_store %arg9[%c64_57, %c0_58], %142 {strides = array<i32>} : memref<72x512xf32, #tpu.memory_space<vmem>>, vector<8x512xf32>,
    %c0_59 = arith.constant 0 : index
    %c0_60 = arith.constant 0 : index
    %144 = vector.load %arg5[%c0_59, %c0_60] : memref<8x72xf32, #tpu.memory_space<vmem>>, vector<8x72xf32>
    %c0_61 = arith.constant 0 : index
    %c0_62 = arith.constant 0 : index
    %145 = vector.load %arg9[%c0_61, %c0_62] : memref<72x512xf32, #tpu.memory_space<vmem>>, vector<72x512xf32>
    %cst_63 = arith.constant dense<0.000000e+00> : vector<8x512xf32>
    %146 = tpu.matmul %144, %145, %cst_63 {dimension_numbers = #tpu.dot_dimension_numbers<[1], [0], [0], [1], [0, 0, 1, 1], [], []>} : vector<8x72xf32>, vector<72x512xf32>, vector<8x512xf32> -> vector<8x512xf32>
    %c0_64 = arith.constant 0 : index
    %c0_65 = arith.constant 0 : index
    %147 = vector.load %arg6[%c0_64, %c0_65] : memref<8x1xf32, #tpu.memory_space<vmem>>, vector<8x1xf32>
    %148 = vector.broadcast %147 : vector<8x1xf32> to vector<8x512xf32>
    %149 = arith.addf %146, %148 : vector<8x512xf32>
    %150 = vector.extract_strided_slice %149 {offsets = [0, 0], sizes = [8, 256], strides = [1, 1]} : vector<8x512xf32> to vector<8x256xf32>
    %cst_66 = arith.constant 1.000000e+00 : f32
    %151 = vector.broadcast %cst_66 : f32 to vector<8x256xf32>
    %152 = arith.mulf %150, %151 : vector<8x256xf32>
    %c0_67 = arith.constant 0 : index
    %c0_68 = arith.constant 0 : index
    %c0_69 = arith.constant 0 : index
    %153 = vector.load %arg1[%c0_67, %c0_68, %c0_69] : memref<2x8x256xf32, #tpu.memory_space<vmem>>, vector<1x8x256xf32>
    %154 = vector.shape_cast %153 : vector<1x8x256xf32> to vector<8x256xf32>
    %155 = arith.addf %152, %154 : vector<8x256xf32>
    %c0_70 = arith.constant 0 : index
    %c0_71 = arith.constant 0 : index
    %c0_72 = arith.constant 0 : index
    %156 = vector.load %arg7[%c0_70, %c0_71, %c0_72] : memref<2x8x256xf32, #tpu.memory_space<vmem>>, vector<1x8x256xf32>
    %157 = vector.shape_cast %156 : vector<1x8x256xf32> to vector<8x256xf32>
    %158 = vector.shape_cast %155 : vector<8x256xf32> to vector<1x8x256xf32>
    tpu.vector_store %arg7[%c0_70, %c0_71, %c0_72], %158 {strides = array<i32>} : memref<2x8x256xf32, #tpu.memory_space<vmem>>, vector<1x8x256xf32>,
    %159 = vector.extract_strided_slice %149 {offsets = [0, 256], sizes = [8, 256], strides = [1, 1]} : vector<8x512xf32> to vector<8x256xf32>
    %cst_73 = arith.constant 1.000000e+00 : f32
    %160 = vector.broadcast %cst_73 : f32 to vector<8x256xf32>
    %161 = arith.mulf %159, %160 : vector<8x256xf32>
    %c1_74 = arith.constant 1 : index
    %c0_75 = arith.constant 0 : index
    %c0_76 = arith.constant 0 : index
    %162 = vector.load %arg1[%c1_74, %c0_75, %c0_76] : memref<2x8x256xf32, #tpu.memory_space<vmem>>, vector<1x8x256xf32>
    %163 = vector.shape_cast %162 : vector<1x8x256xf32> to vector<8x256xf32>
    %164 = arith.addf %161, %163 : vector<8x256xf32>
    %c1_77 = arith.constant 1 : index
    %c0_78 = arith.constant 0 : index
    %c0_79 = arith.constant 0 : index
    %165 = vector.load %arg7[%c1_77, %c0_78, %c0_79] : memref<2x8x256xf32, #tpu.memory_space<vmem>>, vector<1x8x256xf32>
    %166 = vector.shape_cast %165 : vector<1x8x256xf32> to vector<8x256xf32>
    %167 = vector.shape_cast %164 : vector<8x256xf32> to vector<1x8x256xf32>
    tpu.vector_store %arg7[%c1_77, %c0_78, %c0_79], %167 {strides = array<i32>} : memref<2x8x256xf32, #tpu.memory_space<vmem>>, vector<1x8x256xf32>,
    return
  }
  func.func @transform_0(%arg0: i32) -> (i32, i32, i32) {
    %c0_i32 = arith.constant 0 : i32
    %c0_i32_0 = arith.constant 0 : i32
    %c0_i32_1 = arith.constant 0 : i32
    return %arg0, %c0_i32, %c0_i32_0 : i32, i32, i32
  }
  func.func @transform_1(%arg0: i32) -> (i32, i32) {
    %c0_i32 = arith.constant 0 : i32
    %c0_i32_0 = arith.constant 0 : i32
    %c0_i32_1 = arith.constant 0 : i32
    return %c0_i32, %c0_i32_0 : i32, i32
  }
  func.func @transform_2(%arg0: i32) -> (i32, i32) {
    %c0_i32 = arith.constant 0 : i32
    %c0_i32_0 = arith.constant 0 : i32
    %c0_i32_1 = arith.constant 0 : i32
    return %c0_i32, %c0_i32_0 : i32, i32
  }
  func.func @transform_3(%arg0: i32) -> (i32, i32) {
    %c0_i32 = arith.constant 0 : i32
    %c0_i32_0 = arith.constant 0 : i32
    %c0_i32_1 = arith.constant 0 : i32
    return %c0_i32, %c0_i32_0 : i32, i32
  }
  func.func @transform_4(%arg0: i32) -> (i32, i32) {
    %c0_i32 = arith.constant 0 : i32
    %c0_i32_0 = arith.constant 0 : i32
    %c0_i32_1 = arith.constant 0 : i32
    return %c0_i32, %c0_i32_0 : i32, i32
  }
  func.func @transform_5(%arg0: i32) -> (i32, i32) {
    %c0_i32 = arith.constant 0 : i32
    %c0_i32_0 = arith.constant 0 : i32
    %c0_i32_1 = arith.constant 0 : i32
    return %c0_i32, %c0_i32_0 : i32, i32
  }
  func.func @transform_6(%arg0: i32) -> (i32, i32, i32) {
    %c0_i32 = arith.constant 0 : i32
    %c0_i32_0 = arith.constant 0 : i32
    %c0_i32_1 = arith.constant 0 : i32
    return %arg0, %c0_i32, %c0_i32_0 : i32, i32, i32
  }
}

</mosaic_0001>

<bundles_post_ra>
// kernel: tpu_custom_call.1
= control target key start
LH: loop header
LB: loop body
LE: loop exit
PB: predicated region body
PF: predicated region fallthrough
CT: control target
= control target key end

     0   :  { %11 = vsyncpa [#allocation5], 0  ;;  %s2042_s0 = inlined_call_operand.hbm [shape: f32[8,8,256], index: 0, kind: input, shape index: {}]   ;;  %s2043_s1 = inlined_call_operand.hbm [shape: f32[9,512], index: 1, kind: input, shape index: {}]   ;;  %s2044_s2 = inlined_call_operand.vmem [shape: f32[8,72], index: 2, kind: input, shape index: {}]   ;;  %s2045_s3 = inlined_call_operand.vmem [shape: f32[8,1], index: 3, kind: input, shape index: {}]   ;;  %s2046_s4 = inlined_call_operand.vmem [shape: f32[8,72], index: 4, kind: input, shape index: {}]   ;;  %s2047_s5 = inlined_call_operand.vmem [shape: f32[8,1], index: 5, kind: input, shape index: {}]   ;;  %s2048_s6 = inlined_call_operand.hbm [shape: f32[8,8,256], index: 6, kind: output, shape index: {}]  }
   0x1   :  { %13 = vsyncpa [#allocation5 + $0x1], 0 }
   0x2   :  { %14 = vsyncpa [#allocation8], 0 }
   0x3   :  { %15 = vsyncpa [#allocation6], 0 }
   0x4   :  { %17 = vsyncpa [#allocation6 + $0x1], 0  ;;  %s1368_s21 = smov 0   ;;  %s1370_s22 = smov 0  }
   0x5   :  { %s1372_s23 = smov 0   ;;  %s1374_s24 = smov 0  }
   0x6 LB: > { %s1389_s25 = sadd.s32 4294967295, %s1316_s24   ;;  %s1073_s26 = sadd.s32 4294967294, %s1316_s24   ;;  %s1316_s24 = sphi %s1374_s24, %s2065_s24   ;;  %s1312_s23 = sphi %s1372_s23, %s2064_s23   ;;  %s1308_s22 = sphi %s1370_s22, %s2063_s22   ;;  %s1304_s21 = sphi %s1368_s21, %s2062_s21  }
   0x7   : > { %p43_p0 = scmp.ne.s32.totalorder %s1308_s22, %s1304_s21  ;;  %p44_p1 = scmp.eq.s32.totalorder %s1389_s25, 0 }
   0x8   : > { %p172_p2 = scmp.eq.s32.totalorder %s1389_s25, 3  ;;  %p178_p3 = scmp.eq.s32.totalorder %s1073_s26, 3 }
   0x9   : > { %p1398_p4 = por %p44_p1, %p43_p0  ;;  %p1074_p5 = scmp.ge.s32.totalorder %s1316_s24, 1 }
   0xa   : > { %p1403_p6 = por %p178_p3, %p43_p0  ;;  %p185_p7 = scmp.lt.s32.totalorder %s1316_s24, 5 }
   0xb   : > { %s196_s7 = sshll.u32 %s2043_s1, 4  ;;  %s1318_s9 = smov [#allocation7]   ;;  %s197_s7 = int_to_ptr.hbm [resolvable:$true] %s196_s7 }
   0xc   : > { %p1411_p8 = pnand %p1074_p5, %p185_p7  ;;  %s198_s10 = sshll.u32 %s1318_s9, 4  ;;  %s199_s10 = int_to_ptr.vmem [resolvable:$true] %s198_s10 }
   0xd   : > { %s1420_s11 = sadd.s32 1, %s1316_s24   ;;  %s1319_s12 = smov 512  }
   0xe   : > { %p1117_p9 = pneg %p1411_p8  ;;  %s1320_s13 = smov 32  }
   0xf   : > { %s27_s14 = ssub.s32 %s1316_s24, %s1420_s11  ;;  %s30_s15 = sadd.s32 1, %s1312_s23 }
  0x10   : > { %p1118_p10 = pnand %p1117_p9, %p44_p1  ;;  %p28_p11 = scmp.eq.s32.totalorder %s27_s14, 0 }
  0x11   : > { %p37_p12 = scmp.ne.s32.totalorder %s1312_s23, %s1308_s22  ;;  %p38_p13 = scmp.eq.s32.totalorder %s1316_s24, 0 }
  0x12   : > { %1120 = dma.hbm_to_vmem [thread:$0]  (!%p1118_p10), %s197_s7, 1024, %s199_s10, [#allocation8], %s1319_s12, %s1319_s12, %s1320_s13  }
  0x13   : > { %p1130_p0 = scmp.lt.s32.totalorder %s1316_s24, 4  ;;  %p39_p3 = por %p38_p13, %p37_p12 }
  0x14   : > { %s1430_s16 = scalar_select %p28_p11, %s1312_s23, %s30_s15  }
  0x15   : > { %p1434_p5 = por %p172_p2, %p37_p12  ;;  %s224_s18 = sand.u32 1, %s1312_s23  }
  0x16   : > { %s1106_s19 = sshll.u32 %s1316_s24, 5  ;;  %s1077_s20 = sshll.u32 %s224_s18, 5 }
  0x17   : > { %s234_s30 = scalar_lea.hbm %s2042_s0, %s1106_s19  ;;  %s228_s9 = scalar_lea.vmem [#allocation4], %s1077_s20 }
  0x18   : > { %s235_s7 = sshll.u32 %s234_s30, 4  ;;  %s237_s10 = sshll.u32 %s228_s9, 4  ;;  %s236_s7 = int_to_ptr.hbm [resolvable:$true] %s235_s7  ;;  %s238_s10 = int_to_ptr.vmem [resolvable:$true] %s237_s10 }
  0x19   : > { %p1445_p7 = pnand %p1130_p0, %p39_p3  ;;  %s225_s13 = scalar_lea.sflag [#allocation5], %s224_s18 }
  0x1a   : > { %s1216_s14 = sshra.s32 %s236_s7, 4  ;;  %s1223_s26 = scalar_lea.hbm %s2042_s0, 128  ;;  %s1217_s14 = int_to_ptr.hbm [resolvable:$true] %s1216_s14 }
  0x1b   : > { %s1218_s15 = scalar_lea.hbm %s1217_s14, 32  ;;  %p1220_p9 = pneg %p1445_p7 }
  0x1c   : > { %p1219_p2 = scmp.ne.s32.totalorder %s1217_s14, %s1218_s15  ;;  %p1224_p12 = scmp.lt.s32.totalorder %s1217_s14, %s2042_s0 }
  0x1d   : > { %p1225_p13 = scmp.lt.s32.totalorder %s1223_s26, %s1218_s15 }
  0x1e   : > { %p1221_p10 = pnand %p1220_p9, %p1219_p2 }
  0x1f   : > { %p1226_p0 = por %p1225_p13, %p1224_p12 }
  0x20   : > { %p1222_p11 = pneg %p1221_p10 }
  0x22   : > { %p1227_p3 = pnand %p1226_p0, %p1222_p11 }
  0x24   : > { %1230 = shalt.err (!%p1227_p3)
}
  0x25   : > { %s1321_s18 = smov 256   ;;  %s1322_s9 = smov 16  }
  0x26   : > { %1124 = dma.hbm_to_vmem [thread:$0]  (!%p1445_p7), %s236_s7, 512, %s238_s10, %s225_s13, %s1321_s18, %s1321_s18, %s1322_s9  }
  0x27   : > { %249 = sbr.rel (%p1411_p8) target bundleno = 717 (0x2cd), region = 44  ;;  %s1462_s19 = sand.u32 (!%p1411_p8), 1, %s1308_s22  }
  0x28   : > { %s1082_s14 = sshll.u32 (!%p1411_p8), %s1462_s19, 5  ;;  %s252_s15 = scalar_lea.sflag (!%p1411_p8), [#allocation5], %s1462_s19 }
  0x29   : > { %s255_s20 = scalar_lea.vmem (!%p1411_p8), [#allocation4], %s1082_s14 }
  0x2c   : > { %1291 = dma.done.wait (%p1398_p4), %s252_s15, 512  }
  0x2d   : > { %1293 = vsyncadd (%p1398_p4), %s252_s15, 4294966784 }
  0x2e   : > { %1295 = dma.done.wait (%p44_p1), [#allocation8], 1024  }
  0x2f   : > { %1297 = vsyncadd (%p44_p1), [#allocation8], 4294966272  ;;  %v1476_v0 = vld [vmem:[%s255_s20 + $0x18] sm:$0xff]  ;;  %v1478_v1 = vld [vmem:[%s255_s20 + $0x10] sm:$0xff]  ;;  %s1323_s8 = smov 111   ;;  %s1324_s7 = smov 112   ;;  %v321_v6 = vlaneseq }
  0x30   : > { %v1480_v2 = vld [vmem:[%s255_s20] sm:$0xff]  ;;  %508 = vrot.lane.b32.xlu1 %v1476_v0, %s1323_s8  ;;  %481 = vrot.lane.b32.xlu2 %v1478_v1, %s1324_s7  ;;  %s1325_s27 = smov 113   ;;  %s1326_s10 = smov 127   ;;  %v1506_v3 = vld [vmem:[%s255_s20 + $0x8] sm:$0xff]  ;;  %v1553_v8 = vld [vmem:[#allocation7 + $0x38] ss:$0 sm:$0xff] }
  0x31   : > { %502 = vrot.lane.b32.xlu0 %v1480_v2, %s1323_s8  ;;  %s1327_s12 = smov 1   ;;  %s1328_s13 = smov 15   ;;  %v1550_v7 = vand.u32 127, %v321_v6  ;;  %v1561_v14 = vld [vmem:[#allocation7 + $0x18] sm:$0xff]  ;;  %v1563_v15 = vld [vmem:[#allocation7 + $0x10] sm:$0xff]  ;;  %v1624_v53 = vld [vmem:[#allocation7] sm:$0xff] }
  0x32   : > { %s1329_s26 = smov 16   ;;  %s1330_s29 = smov 17   ;;  %v493_v16 = vperm.slane %v1561_v14, 7  ;;  %v1567_v17 = vld [vmem:[#allocation7 + $0x30] ss:$0 sm:$0xff]  ;;  %v492_v21 = vperm.slane %v1563_v15, 7 }
  0x33   : > { %vm510_vm0 = vcmp.lt.s32.totalorder %v1550_v7, 111  ;;  %vm485_vm1 = vcmp.lt.s32.totalorder %v1550_v7, 112  ;;  %v467_v28 = vperm.slane %v1563_v15, 6  ;;  %vm460_vm2 = vcmp.lt.s32.totalorder %v1550_v7, 113  ;;  %v1620_v50 = vld [vmem:[#allocation7 + $0x20] ss:$0 sm:$0xff] }
  0x34   : > { %v468_v29 = vperm.slane %v1561_v14, 6  ;;  %v442_v37 = vperm.slane %v1563_v15, 5  ;;  %v417_v38 = vperm.slane %v1563_v15, 4  ;;  %vm435_vm3 = vcmp.lt.s32.totalorder %v1550_v7, 127  ;;  %v1622_v51 = vld [vmem:[#allocation7 + $0x28] ss:$0 sm:$0xff] }
  0x35   : > { %v443_v39 = vperm.slane %v1561_v14, 5  ;;  %v418_v40 = vperm.slane %v1561_v14, 4  ;;  %v1626_v54 = vld [vmem:[#allocation7 + $0x8] sm:$0xff]  ;;  %v490_v56 = vperm.slane %v1624_v53, 7  ;;  %vm398_vm4 = vcmp.lt.s32.totalorder %v1550_v7, 1 }
  0x36   : > { %v421_v46 = vmul.f32 %v1478_v1, %v417_v38  ;;  %v491_v57 = vperm.slane %v1626_v54, 7  ;;  %v466_v6 = vperm.slane %v1626_v54, 6  ;;  %vm373_vm5 = vcmp.lt.s32.totalorder %v1550_v7, 15 }
  0x37   : > { %v422_v48 = vmul.f32 %v1476_v0, %v418_v40  ;;  %vm348_vm6 = vcmp.lt.s32.totalorder %v1550_v7, 16  ;;  %vm323_vm7 = vcmp.lt.s32.totalorder %v1550_v7, 17  ;;  %vm570_vm8 = vcmask 588800  }
  0x38   : > { %483 = vrot.lane.b32.xlu2 %v1476_v0, %s1324_s7  ;;  %477 = vrot.lane.b32.xlu1 %v1480_v2, %s1324_s7 }
  0x39   : > { %506 = vrot.lane.b32.xlu0 %v1478_v1, %s1323_s8 }
  0x40   : > { %458 = vrot.lane.b32.xlu2 %v1476_v0, %s1325_s27  ;;  %456 = vrot.lane.b32.xlu1 %v1478_v1, %s1325_s27 }
  0x41   : > { %452 = vrot.lane.b32.xlu0 %v1480_v2, %s1325_s27 }
  0x48   : > { %433 = vrot.lane.b32.xlu2 %v1476_v0, %s1326_s10  ;;  %431 = vrot.lane.b32.xlu1 %v1478_v1, %s1326_s10 }
  0x49   : > { %427 = vrot.lane.b32.xlu0 %v1480_v2, %s1326_s10 }
  0x50   : > { %392 = vrot.lane.b32.xlu2 %v1506_v3, %s1327_s12  ;;  %479 = vrot.lane.b32.xlu1 %v1506_v3, %s1324_s7 }
  0x51   : > { %504 = vrot.lane.b32.xlu0 %v1506_v3, %s1323_s8 }
  0x58   : > { %454 = vrot.lane.b32.xlu2 %v1506_v3, %s1325_s27  ;;  %396 = vrot.lane.b32.xlu1 %v1476_v0, %s1327_s12 }
  0x59   : > { %394 = vrot.lane.b32.xlu0 %v1478_v1, %s1327_s12 }
  0x60   : > { %371 = vrot.lane.b32.xlu2 %v1476_v0, %s1328_s13  ;;  %369 = vrot.lane.b32.xlu1 %v1478_v1, %s1328_s13 }
  0x61   : > { %367 = vrot.lane.b32.xlu0 %v1506_v3, %s1328_s13 }
  0x68   : > { %344 = vrot.lane.b32.xlu2 %v1478_v1, %s1329_s26  ;;  %342 = vrot.lane.b32.xlu1 %v1506_v3, %s1329_s26 }
  0x69   : > { %429 = vrot.lane.b32.xlu0 %v1506_v3, %s1326_s10 }
  0x70   : > { %317 = vrot.lane.b32.xlu2 %v1478_v1, %s1330_s29  ;;  %315 = vrot.lane.b32.xlu1 %v1506_v3, %s1330_s29 }
  0x71   : > { %346 = vrot.lane.b32.xlu0 %v1476_v0, %s1329_s26 }
  0x78   : > { %365 = vrot.lane.b32.xlu2 %v1480_v2, %s1328_s13  ;;  %390 = vrot.lane.b32.xlu1 %v1480_v2, %s1327_s12 }
  0x79   : > { %319 = vrot.lane.b32.xlu0 %v1476_v0, %s1330_s29 }
  0x80   : > { %313 = vrot.lane.b32.xlu1 %v1480_v2, %s1330_s29 }
  0x81   : > { %340 = vrot.lane.b32.xlu0 %v1480_v2, %s1329_s26 }
  0x8a   : > { %v1548_v4 = vpop.permute.xlu2 %481 }
  0x92   : > { %v484_v5 = vpop.permute.xlu2 %483 }
  0x93   : > { %v486_v22 = vsel %vm485_vm1, %v1548_v4, %v484_v5 }
  0x94   : > { %v496_v27 = vmul.f32 %v492_v21, %v486_v22 }
  0x9a   : > { %v459_v9 = vpop.permute.xlu2 %458 }
  0xa2   : > { %v509_v10 = vpop.permute.xlu1 %508  ;;  %v434_v23 = vpop.permute.xlu2 %433 }
  0xa3   : > { %v1555_v11 = vpop.permute.xlu0 %502 }
  0xa4   : > { %v514_v12 = vsel %vm510_vm0, %v509_v10, %v1555_v11 }
  0xa5   : > { %v522_v13 = vmul.f32 %v1553_v8, %v514_v12 }
  0xa7   : > { %641 = vmatpush.msra.mxu3 %v522_v13 }
  0xaa   : > { %v478_v18 = vpop.permute.xlu1 %477  ;;  %v1593_v36 = vpop.permute.xlu2 %392 }
  0xab   : > { %v489_v19 = vsel %vm485_vm1, %v484_v5, %v478_v18  ;;  %v507_v20 = vpop.permute.xlu0 %506  ;;  %v465_v5 = vperm.slane %v1624_v53, 6 }
  0xac   : > { %v511_v24 = vsel %vm510_vm0, %v507_v20, %v509_v10  ;;  %v497_v25 = vmul.f32 %v493_v16, %v489_v19  ;;  %v406_v19 = vperm.slane %v1561_v14, 3 }
  0xad   : > { %v521_v26 = vmul.f32 %v1567_v17, %v511_v24 }
  0xae   : > { %642 = vmatpush.msra.mxu3 %v497_v25 }
  0xaf   : > { %621 = vmatpush.msra.mxu2 %v521_v26 }
  0xb1   : > { %622 = vmatpush.msra.mxu2 %v496_v27 }
  0xb2   : > { %v457_v30 = vpop.permute.xlu1 %456  ;;  %v455_v49 = vpop.permute.xlu2 %454 }
  0xb3   : > { %v461_v31 = vsel %vm460_vm2, %v457_v30, %v459_v9  ;;  %v453_v32 = vpop.permute.xlu0 %452 }
  0xb4   : > { %v464_v33 = vsel %vm460_vm2, %v459_v9, %v453_v32  ;;  %v471_v34 = vmul.f32 %v467_v28, %v461_v31  ;;  %v463_v9 = vsel %vm460_vm2, %v453_v32, %v455_v49  ;;  %v380_v31 = vperm.slane %v1563_v15, 2 }
  0xb5   : > { %v472_v35 = vmul.f32 %v468_v29, %v464_v33  ;;  %v469_v12 = vmul.f32 %v465_v5, %v463_v9 }
  0xb6   : > { %623 = vmatpush.msra.mxu2 %v471_v34 }
  0xb7   : > { %643 = vmatpush.msra.mxu3 %v472_v35 }
  0xba   : > { %v1600_v41 = vpop.permute.xlu1 %431 }
  0xbb   : > { %v436_v42 = vsel %vm435_vm3, %v1600_v41, %v434_v23  ;;  %v1605_v43 = vpop.permute.xlu0 %427 }
  0xbc   : > { %v439_v44 = vsel %vm435_vm3, %v434_v23, %v1605_v43  ;;  %v446_v45 = vmul.f32 %v442_v37, %v436_v42 }
  0xbd   : > { %v447_v47 = vmul.f32 %v443_v39, %v439_v44 }
  0xbe   : > { %624 = vmatpush.msra.mxu2 %v446_v45 }
  0xbf   : > { %644 = vmatpush.msra.mxu3 %v447_v47  ;;  %v440_v47 = vperm.slane %v1624_v53, 5 }
  0xc0   : > { %625 = vmatpush.msra.mxu2 %v421_v46  ;;  %v355_v46 = vperm.slane %v1563_v15, 1 }
  0xc1   : > { %645 = vmatpush.msra.mxu3 %v422_v48  ;;  %v441_v48 = vperm.slane %v1626_v54, 5 }
  0xc2   : > { %v480_v52 = vpop.permute.xlu1 %479 }
  0xc3   : > { %v505_v55 = vpop.permute.xlu0 %504  ;;  %v487_v58 = vsel %vm485_vm1, %v480_v52, %v1548_v4  ;;  %v488_v59 = vsel %vm485_vm1, %v478_v18, %v480_v52  ;;  %v462_v4 = vsel %vm460_vm2, %v455_v49, %v457_v30  ;;  %v405_v18 = vperm.slane %v1563_v15, 3 }
  0xc4   : > { %v513_v60 = vsel %vm510_vm0, %v1555_v11, %v505_v55  ;;  %v512_v61 = vsel %vm510_vm0, %v505_v55, %v507_v20  ;;  %v494_v10 = vmul.f32 %v490_v56, %v488_v59  ;;  %v495_v11 = vmul.f32 %v491_v57, %v487_v58  ;;  %v1659_v20 = vpop.permute.xlu2 %371  ;;  %v564_v58 = vld [vmem:[%s2045_s3] sm:$0xff] }
  0xc5   : > { %v519_v62 = vmul.f32 %v1620_v50, %v513_v60  ;;  %v520_v63 = vmul.f32 %v1622_v51, %v512_v61  ;;  %v470_v13 = vmul.f32 %v466_v6, %v462_v4  ;;  %v381_v30 = vperm.slane %v1561_v14, 2 }
  0xc6   : > { %v415_v49 = vperm.slane %v1624_v53, 4  ;;  %v416_v52 = vperm.slane %v1626_v54, 4  ;;  %v1331_v61 = vmov 0  }
  0xc7   : > { %581 = vmatpush.msra.mxu0 %v519_v62  ;;  %601 = vmatpush.msra.mxu1 %v520_v63 }
  0xc8   : > { %1180 = vset.pattern.permute.xlu2 %v1331_v61  ;;  %1181 = vset.pattern.permute.xlu0 %v1331_v61 }
  0xc9   : > { %582 = vmatpush.msra.mxu0 %v494_v10  ;;  %602 = vmatpush.msra.mxu1 %v495_v11  ;;  %v419_v11 = vmul.f32 %v415_v49, %v1480_v2 }
  0xca   : > { %v1661_v22 = vpop.permute.xlu1 %396  ;;  %567 = vperm.xlu2 %1180, %v564_v58  }
  0xcb   : > { %583 = vmatpush.msra.mxu0 %v469_v12  ;;  %603 = vmatpush.msra.mxu1 %v470_v13  ;;  %v395_v23 = vpop.permute.xlu0 %394  ;;  %v356_v13 = vperm.slane %v1561_v14, 1 }
  0xcc   : > { %v399_v24 = vsel %vm398_vm4, %v395_v23, %v1661_v22  ;;  %v400_v25 = vsel %vm398_vm4, %v1593_v36, %v395_v23  ;;  %v345_v35 = vpop.permute.xlu2 %344 }
  0xcd   : > { %v409_v26 = vmul.f32 %v405_v18, %v400_v25  ;;  %v410_v27 = vmul.f32 %v406_v19, %v399_v24 }
  0xcf   : > { %626 = vmatpush.msra.mxu2 %v409_v26  ;;  %646 = vmatpush.msra.mxu3 %v410_v27 }
  0xd2   : > { %v370_v32 = vpop.permute.xlu1 %369 }
  0xd3   : > { %v374_v33 = vsel %vm373_vm5, %v370_v32, %v1659_v20  ;;  %v368_v34 = vpop.permute.xlu0 %367 }
  0xd4   : > { %v375_v42 = vsel %vm373_vm5, %v368_v34, %v370_v32  ;;  %v385_v44 = vmul.f32 %v381_v30, %v374_v33  ;;  %v318_v12 = vpop.permute.xlu2 %317  ;;  %v527_v32 = vld [vmem:[%s2044_s2] sm:$0xff] }
  0xd5   : > { %v384_v45 = vmul.f32 %v380_v31, %v375_v42 }
  0xd6   : > { %647 = vmatpush.msra.mxu3 %v385_v44  ;;  %v403_v44 = vperm.slane %v1624_v53, 3 }
  0xd7   : > { %627 = vmatpush.msra.mxu2 %v384_v45  ;;  %v331_v45 = vperm.slane %v1561_v14, 0 }
  0xda   : > { %v1691_v55 = vpop.permute.xlu1 %342 }
  0xdb   : > { %v350_v59 = vsel %vm348_vm6, %v1691_v55, %v345_v35  ;;  %v430_v60 = vpop.permute.xlu0 %429 }
  0xdc   : > { %v437_v62 = vsel %vm435_vm3, %v430_v60, %v1600_v41  ;;  %v438_v63 = vsel %vm435_vm3, %v1605_v43, %v430_v60  ;;  %v359_v4 = vmul.f32 %v355_v46, %v350_v59  ;;  %v420_v41 = vmul.f32 %v416_v52, %v1506_v3  ;;  %v366_v42 = vpop.permute.xlu2 %365 }
  0xdd   : > { %v444_v9 = vmul.f32 %v440_v47, %v438_v63  ;;  %v445_v10 = vmul.f32 %v441_v48, %v437_v62  ;;  %v330_v43 = vperm.slane %v1563_v15, 0  ;;  %v378_v59 = vperm.slane %v1624_v53, 2 }
  0xde   : > { %628 = vmatpush.msra.mxu2 %v359_v4  ;;  %v379_v60 = vperm.slane %v1626_v54, 2  ;;  %v377_v61 = vsel %vm373_vm5, %v1659_v20, %v366_v42  ;;  %v376_v62 = vsel %vm373_vm5, %v366_v42, %v368_v34 }
  0xdf   : > { %584 = vmatpush.msra.mxu0 %v444_v9  ;;  %604 = vmatpush.msra.mxu1 %v445_v10 }
  0xe1   : > { %585 = vmatpush.msra.mxu0 %v419_v11  ;;  %605 = vmatpush.msra.mxu1 %v420_v41  ;;  %v2052_v41 = vperm.slane %v1624_v53, 1 }
  0xe2   : > { %v316_v23 = vpop.permute.xlu1 %315 }
  0xe3   : > { %v325_v24 = vsel %vm323_vm7, %v316_v23, %v318_v12  ;;  %v347_v25 = vpop.permute.xlu0 %346 }
  0xe4   : > { %v349_v26 = vsel %vm348_vm6, %v345_v35, %v347_v25  ;;  %v334_v27 = vmul.f32 %v330_v43, %v325_v24  ;;  %v404_v35 = vperm.slane %v1626_v54, 3 }
  0xe5   : > { %v360_v33 = vmul.f32 %v356_v13, %v349_v26 }
  0xe6   : > { %629 = vmatpush.msra.mxu2 %v334_v27  ;;  %v2050_v27 = vperm.slane %v1624_v53, 0 }
  0xe7   : > { %648 = vmatpush.msra.mxu3 %v360_v33  ;;  %1089 = vmatmul.msk.f32.vlgmr.msra.gmra.mxu2 %vm570_vm8, %v527_v32  ;;  %v2049_v33 = vperm.slane %v1626_v54, 0 }
  0xea   : > { %v391_v58 = vpop.permute.xlu1 %390 }
  0xeb   : > { %v401_v63 = vsel %vm398_vm4, %v391_v58, %v1593_v36  ;;  %v402_v4 = vsel %vm398_vm4, %v1661_v22, %v391_v58  ;;  %v320_v9 = vpop.permute.xlu0 %319  ;;  %v382_v36 = vmul.f32 %v378_v59, %v377_v61  ;;  %v383_v22 = vmul.f32 %v379_v60, %v376_v62 }
  0xec   : > { %v324_v10 = vsel %vm323_vm7, %v318_v12, %v320_v9  ;;  %v407_v11 = vmul.f32 %v403_v44, %v402_v4  ;;  %v408_v20 = vmul.f32 %v404_v35, %v401_v63  ;;  %v2051_v12 = vperm.slane %v1626_v54, 1 }
  0xed   : > { %v335_v34 = vmul.f32 %v331_v45, %v324_v10 }
  0xee   : > { %586 = vmatpush.msra.mxu0 %v407_v11  ;;  %606 = vmatpush.msra.mxu1 %v408_v20 }
  0xef   : > { %649 = vmatpush.msra.mxu3 %v335_v34 }
  0xf0   : > { %587 = vmatpush.msra.mxu0 %v382_v36  ;;  %607 = vmatpush.msra.mxu1 %v383_v22 }
  0xf1   : > { %1090 = vmatmul.msk.f32.vlgmr.msra.gmra.mxu3 %vm570_vm8, %v527_v32 }
  0xf2   : > { %v314_v24 = vpop.permute.xlu1 %313 }
  0xf3   : > { %v341_v26 = vpop.permute.xlu0 %340  ;;  %v326_v42 = vsel %vm323_vm7, %v314_v24, %v316_v23  ;;  %v327_v58 = vsel %vm323_vm7, %v320_v9, %v314_v24 }
  0xf4   : > { %v351_v61 = vsel %vm348_vm6, %v341_v26, %v1691_v55  ;;  %v352_v62 = vsel %vm348_vm6, %v347_v25, %v341_v26  ;;  %v332_v23 = vmul.f32 %v2050_v27, %v327_v58  ;;  %v333_v9 = vmul.f32 %v2049_v33, %v326_v42 }
  0xf5   : > { %v357_v63 = vmul.f32 %v2052_v41, %v352_v62  ;;  %v358_v4 = vmul.f32 %v2051_v12, %v351_v61  ;;  %v871_v61 = vld [vmem:[%s2047_s5] sm:$0xff] }
  0xf7   : > { %588 = vmatpush.msra.mxu0 %v357_v63  ;;  %608 = vmatpush.msra.mxu1 %v358_v4 }
  0xf9   : > { %589 = vmatpush.msra.mxu0 %v332_v23  ;;  %609 = vmatpush.msra.mxu1 %v333_v9 }
  0xfa   : > { %1087 = vmatmul.msk.f32.vlgmr.msra.gmra.mxu0 %vm570_vm8, %v527_v32  ;;  %1088 = vmatmul.msk.f32.vlgmr.msra.gmra.mxu1 %vm570_vm8, %v527_v32 }
 0x124   : > { %v568_v55 = vpop.permute.xlu2 %567 }
 0x16a   : > { %v631_v26 = vpop.f32.mrf.mxu2 }
 0x16b   : > { %v632_v42 = vadd.f32 %v631_v26, %v568_v55 }
 0x16d   : > { %v1805_v58 = vmax.f32 %v632_v42, 0.0 }
 0x174   : > { %v651_v22 = vpop.f32.mrf.mxu3 }
 0x175   : > { %v652_v32 = vadd.f32 %v651_v22, %v568_v55 }
 0x177   : > { %v591_v25 = vpop.f32.mrf.mxu0  ;;  %v611_v10 = vpop.f32.mrf.mxu1  ;;  %v657_v24 = vmax.f32 %v652_v32, 0.0 }
 0x178   : > { %v592_v11 = vadd.f32 %v591_v25, %v568_v55  ;;  %v612_v20 = vadd.f32 %v611_v10, %v568_v55 }
 0x17a   : > { %v1784_v34 = vmax.f32 %v592_v11, 0.0  ;;  %v1786_v36 = vmax.f32 %v612_v20, 0.0 }
 0x17c   : > { %728 = vrot.lane.b32.xlu2 %v1786_v36, %s1327_s12  ;;  %796 = vrot.lane.b32.xlu1 %v1786_v36, %s1324_s7 }
 0x17d   : > { %814 = vrot.lane.b32.xlu0 %v1784_v34, %s1323_s8 }
 0x184   : > { %776 = vrot.lane.b32.xlu2 %v1786_v36, %s1325_s27  ;;  %688 = vrot.lane.b32.xlu1 %v1786_v36, %s1329_s26 }
 0x185   : > { %794 = vrot.lane.b32.xlu0 %v1784_v34, %s1324_s7 }
 0x18c   : > { %820 = vrot.lane.b32.xlu2 %v657_v24, %s1323_s8  ;;  %668 = vrot.lane.b32.xlu1 %v1786_v36, %s1330_s29 }
 0x18d   : > { %774 = vrot.lane.b32.xlu0 %v1784_v34, %s1325_s27 }
 0x194   : > { %800 = vrot.lane.b32.xlu2 %v657_v24, %s1324_s7  ;;  %818 = vrot.lane.b32.xlu1 %v1805_v58, %s1323_s8 }
 0x195   : > { %754 = vrot.lane.b32.xlu0 %v1784_v34, %s1326_s10 }
 0x19c   : > { %780 = vrot.lane.b32.xlu2 %v657_v24, %s1325_s27  ;;  %798 = vrot.lane.b32.xlu1 %v1805_v58, %s1324_s7  ;;  %s1266_s7 = scalar_lea.hbm %s2048_s6, 128 }
 0x19d   : > { %816 = vrot.lane.b32.xlu0 %v1786_v36, %s1323_s8 }
 0x1a4   : > { %760 = vrot.lane.b32.xlu2 %v657_v24, %s1326_s10  ;;  %778 = vrot.lane.b32.xlu1 %v1805_v58, %s1325_s27 }
 0x1a5   : > { %708 = vrot.lane.b32.xlu0 %v1786_v36, %s1328_s13 }
 0x1ac   : > { %712 = vrot.lane.b32.xlu2 %v657_v24, %s1328_s13  ;;  %758 = vrot.lane.b32.xlu1 %v1805_v58, %s1326_s10 }
 0x1ad   : > { %756 = vrot.lane.b32.xlu0 %v1786_v36, %s1326_s10  ;;  %s1108_s10 = sshll.u32 %s1389_s25, 5 }
 0x1ae   : > { %s986_s30 = scalar_lea.hbm %s2048_s6, %s1108_s10 }
 0x1af   : > { %s989_s25 = sshll.u32 %s986_s30, 4  ;;  %s990_s25 = int_to_ptr.hbm [resolvable:$true] %s989_s25 }
 0x1b0   : > { %s1260_s9 = sshra.s32 %s990_s25, 4  ;;  %s1261_s9 = int_to_ptr.hbm [resolvable:$true] %s1260_s9 }
 0x1b1   : > { %s1262_s15 = scalar_lea.hbm %s1261_s9, 32  ;;  %p1267_p7 = scmp.lt.s32.totalorder %s1261_s9, %s2048_s6 }
 0x1b2   : > { %p1263_p1 = scmp.ne.s32.totalorder %s1261_s9, %s1262_s15  ;;  %p1268_p2 = scmp.lt.s32.totalorder %s1266_s7, %s1262_s15 }
 0x1b4   : > { %690 = vrot.lane.b32.xlu2 %v1805_v58, %s1329_s26  ;;  %732 = vrot.lane.b32.xlu1 %v657_v24, %s1327_s12  ;;  %p1264_p4 = pnand %p1263_p1, %p1434_p5  ;;  %p1269_p9 = por %p1268_p2, %p1267_p7 }
 0x1b5   : > { %730 = vrot.lane.b32.xlu0 %v1805_v58, %s1327_s12 }
 0x1b6   : > { %p1265_p8 = pneg %p1264_p4 }
 0x1b8   : > { %p1270_p10 = pnand %p1269_p9, %p1265_p8 }
 0x1bc   : > { %670 = vrot.lane.b32.xlu2 %v1805_v58, %s1330_s29  ;;  %710 = vrot.lane.b32.xlu1 %v1805_v58, %s1328_s13 }
 0x1bd   : > { %692 = vrot.lane.b32.xlu0 %v657_v24, %s1329_s26 }
 0x1c4   : > { %706 = vrot.lane.b32.xlu2 %v1784_v34, %s1328_s13  ;;  %726 = vrot.lane.b32.xlu1 %v1784_v34, %s1327_s12  ;;  %s289_s12 = scalar_lea.vmem [#allocation9], %s1082_s14  ;;  %s974_s14 = scalar_lea.sflag [#allocation6], %s1462_s19 }
 0x1c5   : > { %672 = vrot.lane.b32.xlu0 %v657_v24, %s1330_s29  ;;  %s987_s18 = sshll.u32 %s289_s12, 4  ;;  %s988_s18 = int_to_ptr.vmem [resolvable:$true] %s987_s18 }
 0x1cc   : > { %874 = vperm.xlu2 %1180, %v871_v61   ;;  %666 = vrot.lane.b32.xlu1 %v1784_v34, %s1330_s29 }
 0x1cd   : > { %686 = vrot.lane.b32.xlu0 %v1784_v34, %s1329_s26 }
 0x1d6   : > { %v1849_v62 = vpop.permute.xlu2 %728 }
 0x1de   : > { %v777_v63 = vpop.permute.xlu2 %776 }
 0x1e6   : > { %v821_v4 = vpop.permute.xlu2 %820 }
 0x1ee   : > { %v797_v23 = vpop.permute.xlu1 %796  ;;  %v801_v10 = vpop.permute.xlu2 %800 }
 0x1ef   : > { %v815_v9 = vpop.permute.xlu0 %814 }
 0x1f0   : > { %v825_v55 = vsel %vm510_vm0, %v821_v4, %v815_v9 }
 0x1f1   : > { %v829_v25 = vmul.f32 %v1553_v8, %v825_v55 }
 0x1f3   : > { %947 = vmatpush.msrb.mxu3 %v829_v25 }
 0x1f6   : > { %v1854_v11 = vpop.permute.xlu1 %688  ;;  %v781_v26 = vpop.permute.xlu2 %780 }
 0x1f7   : > { %v795_v20 = vpop.permute.xlu0 %794 }
 0x1f8   : > { %v805_v22 = vsel %vm485_vm1, %v801_v10, %v795_v20 }
 0x1f9   : > { %v809_v32 = vmul.f32 %v805_v22, %v493_v16 }
 0x1fb   : > { %948 = vmatpush.msrb.mxu3 %v809_v32 }
 0x1fe   : > { %v1860_v42 = vpop.permute.xlu1 %668  ;;  %v761_v25 = vpop.permute.xlu2 %760 }
 0x1ff   : > { %v775_v61 = vpop.permute.xlu0 %774 }
 0x200   : > { %v785_v33 = vsel %vm460_vm2, %v781_v26, %v775_v61 }
 0x201   : > { %v789_v8 = vmul.f32 %v785_v33, %v468_v29  ;;  %v749_v29 = vmul.f32 %v657_v24, %v418_v40 }
 0x203   : > { %949 = vmatpush.msrb.mxu3 %v789_v8  ;;  %v804_v8 = vsel %vm485_vm1, %v795_v20, %v797_v23 }
 0x206   : > { %v819_v55 = vpop.permute.xlu1 %818 }
 0x207   : > { %v822_v27 = vsel %vm510_vm0, %v819_v55, %v821_v4  ;;  %v755_v12 = vpop.permute.xlu0 %754 }
 0x208   : > { %v765_v16 = vsel %vm435_vm3, %v761_v25, %v755_v12  ;;  %v828_v22 = vmul.f32 %v1567_v17, %v822_v27 }
 0x209   : > { %v769_v32 = vmul.f32 %v765_v16, %v443_v39 }
 0x20a   : > { %927 = vmatpush.msrb.mxu2 %v828_v22 }
 0x20b   : > { %950 = vmatpush.msrb.mxu3 %v769_v32 }
 0x20d   : > { %951 = vmatpush.msrb.mxu3 %v749_v29 }
 0x20e   : > { %v799_v33 = vpop.permute.xlu1 %798 }
 0x20f   : > { %v802_v4 = vsel %vm485_vm1, %v799_v33, %v801_v10  ;;  %v817_v41 = vpop.permute.xlu0 %816  ;;  %v803_v17 = vsel %vm485_vm1, %v797_v23, %v799_v33  ;;  %v784_v10 = vsel %vm460_vm2, %v775_v61, %v777_v63  ;;  %v806_v23 = vmul.f32 %v804_v8, %v490_v56 }
 0x210   : > { %v823_v39 = vsel %vm510_vm0, %v817_v41, %v819_v55  ;;  %v824_v27 = vsel %vm510_vm0, %v815_v9, %v817_v41  ;;  %v808_v40 = vmul.f32 %v802_v4, %v492_v21  ;;  %v807_v55 = vmul.f32 %v803_v17, %v491_v57 }
 0x211   : > { %v826_v24 = vmul.f32 %v1620_v50, %v824_v27  ;;  %v827_v20 = vmul.f32 %v1622_v51, %v823_v39  ;;  %v786_v21 = vmul.f32 %v784_v10, %v465_v5  ;;  %v713_v50 = vpop.permute.xlu2 %712 }
 0x212   : > { %928 = vmatpush.msrb.mxu2 %v808_v40 }
 0x213   : > { %887 = vmatpush.msrb.mxu0 %v826_v24  ;;  %907 = vmatpush.msrb.mxu1 %v827_v20 }
 0x215   : > { %888 = vmatpush.msrb.mxu0 %v806_v23  ;;  %908 = vmatpush.msrb.mxu1 %v807_v55 }
 0x216   : > { %v779_v41 = vpop.permute.xlu1 %778 }
 0x217   : > { %v782_v51 = vsel %vm460_vm2, %v779_v41, %v781_v26  ;;  %v783_v9 = vsel %vm460_vm2, %v777_v63, %v779_v41  ;;  %889 = vmatpush.msrb.mxu0 %v786_v21  ;;  %v709_v61 = vpop.permute.xlu0 %708 }
 0x218   : > { %v787_v56 = vmul.f32 %v783_v9, %v466_v6  ;;  %v788_v57 = vmul.f32 %v782_v51, %v467_v28 }
 0x219   : > { %v691_v32 = vpop.permute.xlu2 %690 }
 0x21a   : > { %909 = vmatpush.msrb.mxu1 %v787_v56  ;;  %929 = vmatpush.msrb.mxu2 %v788_v57  ;;  %v2059_v56 = vperm.slane %v1626_v54, 1 }
 0x21e   : > { %v759_v16 = vpop.permute.xlu1 %758 }
 0x21f   : > { %v762_v5 = vsel %vm435_vm3, %v759_v16, %v761_v25  ;;  %v757_v22 = vpop.permute.xlu0 %756  ;;  %v748_v25 = vmul.f32 %v1805_v58, %v417_v38 }
 0x220   : > { %v763_v26 = vsel %vm435_vm3, %v757_v22, %v759_v16  ;;  %v764_v63 = vsel %vm435_vm3, %v755_v12, %v757_v22  ;;  %v768_v6 = vmul.f32 %v762_v5, %v442_v37  ;;  %v746_v12 = vmul.f32 %v1784_v34, %v415_v49 }
 0x221   : > { %v766_v28 = vmul.f32 %v764_v63, %v440_v47  ;;  %v767_v29 = vmul.f32 %v763_v26, %v441_v48  ;;  %v747_v37 = vmul.f32 %v1786_v36, %v416_v52  ;;  %v671_v34 = vpop.permute.xlu2 %670  ;;  %v695_v36 = vsel %vm348_vm6, %v1854_v11, %v691_v32 }
 0x222   : > { %930 = vmatpush.msrb.mxu2 %v768_v6  ;;  %v675_v27 = vsel %vm323_vm7, %v1860_v42, %v671_v34  ;;  %v700_v40 = vmul.f32 %v695_v36, %v355_v46  ;;  %v2061_v5 = vperm.slane %v1626_v54, 0 }
 0x223   : > { %890 = vmatpush.msrb.mxu0 %v766_v28  ;;  %910 = vmatpush.msrb.mxu1 %v767_v29 }
 0x224   : > { %931 = vmatpush.msrb.mxu2 %v748_v25 }
 0x225   : > { %891 = vmatpush.msrb.mxu0 %v746_v12  ;;  %911 = vmatpush.msrb.mxu1 %v747_v37 }
 0x226   : > { %v733_v47 = vpop.permute.xlu1 %732 }
 0x227   : > { %v731_v48 = vpop.permute.xlu0 %730 }
 0x228   : > { %v734_v33 = vsel %vm398_vm4, %v731_v48, %v733_v47  ;;  %v735_v38 = vsel %vm398_vm4, %v1849_v62, %v731_v48 }
 0x229   : > { %v740_v58 = vmul.f32 %v735_v38, %v405_v18  ;;  %v741_v49 = vmul.f32 %v734_v33, %v406_v19  ;;  %v707_v20 = vpop.permute.xlu2 %706 }
 0x22a   : > { %v717_v23 = vsel %vm373_vm5, %v713_v50, %v707_v20  ;;  %v716_v15 = vsel %vm373_vm5, %v707_v20, %v709_v61 }
 0x22b   : > { %932 = vmatpush.msrb.mxu2 %v740_v58  ;;  %952 = vmatpush.msrb.mxu3 %v741_v49  ;;  %v718_v41 = vmul.f32 %v717_v23, %v378_v59  ;;  %v719_v51 = vmul.f32 %v716_v15, %v379_v60  ;;  %v2058_v60 = vperm.slane %v1624_v53, 1 }
 0x22e   : > { %v711_v52 = vpop.permute.xlu1 %710 }
 0x22f   : > { %v714_v8 = vsel %vm373_vm5, %v711_v52, %v713_v50  ;;  %v715_v4 = vsel %vm373_vm5, %v709_v61, %v711_v52  ;;  %v693_v17 = vpop.permute.xlu0 %692 }
 0x230   : > { %v694_v18 = vsel %vm348_vm6, %v691_v32, %v693_v17  ;;  %v720_v19 = vmul.f32 %v715_v4, %v380_v31  ;;  %v721_v39 = vmul.f32 %v714_v8, %v381_v30  ;;  %v680_v31 = vmul.f32 %v675_v27, %v330_v43  ;;  %v834_v30 = vld [vmem:[%s2046_s4] sm:$0xff] }
 0x231   : > { %v701_v24 = vmul.f32 %v694_v18, %v356_v13  ;;  %v875_v7 = vpop.permute.xlu2 %874 }
 0x232   : > { %933 = vmatpush.msrb.mxu2 %v720_v19  ;;  %953 = vmatpush.msrb.mxu3 %v721_v39 }
 0x234   : > { %934 = vmatpush.msrb.mxu2 %v700_v40  ;;  %954 = vmatpush.msrb.mxu3 %v701_v24 }
 0x236   : > { %v727_v10 = vpop.permute.xlu1 %726  ;;  %935 = vmatpush.msrb.mxu2 %v680_v31 }
 0x237   : > { %v736_v46 = vsel %vm398_vm4, %v727_v10, %v1849_v62  ;;  %v737_v13 = vsel %vm398_vm4, %v733_v47, %v727_v10  ;;  %v673_v55 = vpop.permute.xlu0 %672  ;;  %1093 = vmatmul.msk.f32.vlgmr.msrb.gmra.mxu2 %vm570_vm8, %v834_v30 }
 0x238   : > { %v674_v43 = vsel %vm323_vm7, %v671_v34, %v673_v55  ;;  %v738_v21 = vmul.f32 %v737_v13, %v403_v44  ;;  %v739_v50 = vmul.f32 %v736_v46, %v404_v35 }
 0x239   : > { %v681_v62 = vmul.f32 %v674_v43, %v331_v45 }
 0x23a   : > { %892 = vmatpush.msrb.mxu0 %v738_v21  ;;  %912 = vmatpush.msrb.mxu1 %v739_v50 }
 0x23b   : > { %955 = vmatpush.msrb.mxu3 %v681_v62 }
 0x23c   : > { %1094 = vmatmul.msk.f32.vlgmr.msrb.gmra.mxu3 %vm570_vm8, %v834_v30  ;;  %893 = vmatpush.msrb.mxu0 %v718_v41 }
 0x23d   : > { %913 = vmatpush.msrb.mxu1 %v719_v51 }
 0x23e   : > { %v667_v44 = vpop.permute.xlu1 %666 }
 0x23f   : > { %v687_v9 = vpop.permute.xlu0 %686  ;;  %v676_v14 = vsel %vm323_vm7, %v667_v44, %v1860_v42  ;;  %v677_v35 = vsel %vm323_vm7, %v673_v55, %v667_v44  ;;  %v2060_v42 = vperm.slane %v1624_v53, 0 }
 0x240   : > { %v696_v45 = vsel %vm348_vm6, %v687_v9, %v1854_v11  ;;  %v697_v59 = vsel %vm348_vm6, %v693_v17, %v687_v9  ;;  %v679_v22 = vmul.f32 %v676_v14, %v2061_v5 }
 0x241   : > { %v698_v61 = vmul.f32 %v697_v59, %v2058_v60  ;;  %v699_v57 = vmul.f32 %v696_v45, %v2059_v56  ;;  %v678_v16 = vmul.f32 %v677_v35, %v2060_v42 }
 0x243   : > { %894 = vmatpush.msrb.mxu0 %v698_v61  ;;  %914 = vmatpush.msrb.mxu1 %v699_v57 }
 0x245   : > { %895 = vmatpush.msrb.mxu0 %v678_v16  ;;  %915 = vmatpush.msrb.mxu1 %v679_v22 }
 0x246   : > { %1091 = vmatmul.msk.f32.vlgmr.msrb.gmra.mxu0 %vm570_vm8, %v834_v30  ;;  %1092 = vmatmul.msk.f32.vlgmr.msrb.gmra.mxu1 %vm570_vm8, %v834_v30 }
 0x2ba   : > { %v937_v11 = vpop.f32.mrf.mxu2 }
 0x2bb   : > { %v938_v32 = vadd.f32 %v937_v11, %v875_v7 }
 0x2bd   : > { %v968_v26 = vadd.f32 %v1478_v1, %v938_v32 }
 0x2bf   : > { %1097 = vst [vmem:[%s289_s12 + $0x10] sm:$0xff] %v968_v26  ;;  %v957_v53 = vpop.f32.mrf.mxu3 }
 0x2c0   : > { %v958_v63 = vadd.f32 %v957_v53, %v875_v7 }
 0x2c2   : > { %v969_v54 = vadd.f32 %v1476_v0, %v958_v63 }
 0x2c3   : > { %v897_v6 = vpop.f32.mrf.mxu0  ;;  %v917_v28 = vpop.f32.mrf.mxu1 }
 0x2c4   : > { %1098 = vst [vmem:[%s289_s12 + $0x18] sm:$0xff] %v969_v54  ;;  %v898_v29 = vadd.f32 %v897_v6, %v875_v7  ;;  %v918_v1 = vadd.f32 %v917_v28, %v875_v7 }
 0x2c6   : > { %v962_v25 = vadd.f32 %v898_v29, %v1480_v2  ;;  %v963_v12 = vadd.f32 %v918_v1, %v1506_v3 }
 0x2c8   : > { %964 = vst [vmem:[%s289_s12] sm:$0xff] %v962_v25 }
 0x2c9   : > { %965 = vst [vmem:[%s289_s12 + $0x8] sm:$0xff] %v963_v12 }
 0x2ca   : > { %1273 = shalt.err (!%p1270_p10)
}
 0x2cb   : > { %s1332_s19 = smov 256  }
 0x2cc   : > { %1115 = dma.vmem_to_hbm [thread:$0]  (%p1434_p5), %s988_s18, 512, %s990_s25, %s974_s14, %s1332_s19, %s1332_s19, %s1329_s26  }
 0x2cd PF: > { %p1132_p11 = scmp.ge.s32.totalorder %s1316_s24, 2  ;;  %s1004_s12 = sand.u32 1, %s1304_s21  }
 0x2ce   : > { %s1005_s13 = scalar_lea.sflag [#allocation6], %s1004_s12 }
 0x2cf   : > { %p1126_p12 = pnand %p1132_p11, %p1403_p6 }
 0x2d1   : > { %p1127_p13 = pneg %p1126_p12 }
 0x2d3   : > { %1299 = dma.done.wait (%p1127_p13), %s1005_s13, 512  }
 0x2d4   : > { %1301 = vsyncadd (%p1127_p13), %s1005_s13, 4294966784  ;;  %p20_p0 = scmp.ge.s32.totalorder %s1420_s11, 6   ;;  %s2062_s21 = smov %s1308_s22 }
 0x2d5   : > { %s2063_s22 = smov %s1312_s23  ;;  %s2064_s23 = smov %s1430_s16 }
 0x2d6   : > { %s2065_s24 = smov %s1420_s11  ;;  %22 = sbr.rel (!%p20_p0) target bundleno = 6 (0x6), region = 95 }
 0x2db   :  { %1011 = vsyncpa [#allocation5], 1 }
 0x2dc   :  { %1013 = vsyncpa [#allocation5 + $0x1], 1 }
 0x2dd   :  { %1014 = vsyncpa [#allocation8], 1 }
 0x2de   :  { %1015 = vsyncpa [#allocation6], 1 }
 0x2df   :  { %1017 = vsyncpa [#allocation6 + $0x1], 1 }

</bundles_post_ra>
